<compile_context>
chip_gen: v7x
topology: tpu7x:2x2x1
jax: 0.10.0
libtpu: 0.0.40
codegen_flags: <defaults>
</compile_context>

<pallas_src>
import functools

import jax
import jax.numpy as jnp
from jax.experimental import pallas as pl
from jax.experimental.pallas import tpu as pltpu

_LANE = 128  # TPU lane width: keep every feature dim lane-dense.


def _round_up(n, m):
    return ((n + m - 1) // m) * m


# ----------------------------------------------------------------------------- kernel
def _mlp_fused_kernel(x_ref, *refs, n_layers):
    """Fused MLP forward for one batch tile.

    refs = (w0, b0, w1, b1, ..., w_{L-1}, b_{L-1}, out)
    Weights are bf16 (in_pad, out_pad); biases are f32 (1, out_pad); all feature dims
    zero-padded to a multiple of 128. Intermediate activations never leave vregs/VMEM.
    """
    o_ref = refs[-1]
    p = refs[:-1]

    h = x_ref[...]                      # bf16 (tm, k_pad)
    for i in range(n_layers):
        w = p[2 * i][...]               # bf16 (in_pad, out_pad)
        b = p[2 * i + 1][...]           # f32  (1, out_pad)
        # bf16 x bf16 matmul with f32 MXU accumulation; bias-add / leaky_relu in f32
        # (v5e's VPU has no bf16), then cast back to bf16 for the next dot.
        a = jnp.dot(h, w, preferred_element_type=jnp.float32) + b
        if i < n_layers - 1:
            # F.leaky_relu default negative_slope = 0.01 (hidden layers only)
            a = jnp.where(a >= 0, a, jnp.float32(0.01) * a)
            h = a.astype(jnp.bfloat16)
        else:
            h = a
    o_ref[...] = h.astype(o_ref.dtype)


# ------------------------------------------------------------------- parameter prep
def prepare_mlp_params(params, lane=_LANE):
    """One-time layout prep (out of the hot path).

    Transposes PyTorch-style (out, in) weights to (in, out), casts them to bf16,
    reshapes biases to f32 (1, out), and zero-pads every feature dim (including the
    first layer's input dim) up to a multiple of `lane`. Padded lanes carry exactly 0
    through bias-add and leaky_relu, so the result matches the unpadded math after
    the final slice (up to bf16 rounding of inputs/weights).
    """
    prepped = []
    prev_pad = _round_up(params[0][0].shape[1], lane)   # padded first-layer input dim
    for (w, b) in params:
        out_dim, in_dim = w.shape
        out_pad = _round_up(out_dim, lane)
        wt = jnp.zeros((prev_pad, out_pad), jnp.bfloat16)
        wt = wt.at[:in_dim, :out_dim].set(w.T.astype(jnp.bfloat16))
        bp = jnp.zeros((1, out_pad), jnp.float32).at[0, :out_dim].set(
            b.astype(jnp.float32))
        prepped.append((wt, bp))
        prev_pad = out_pad
    return prepped


# ------------------------------------------------------------------------- forward
@functools.partial(jax.jit, static_argnums=(2,))
def mlp_forward_pallas(x, prepped_params, output_dim):
    """y = MLP(x) with all layers fused into a single Pallas kernel call."""
    n_layers = len(prepped_params)
    flat = [a for wb in prepped_params for a in wb]

    m, k = x.shape
    k_pad = prepped_params[0][0].shape[0]      # padded input width (lane-dense)
    n_pad = prepped_params[-1][0].shape[1]     # padded output width (lane-dense)

    # M tile: multiple of 256 (MXU row dim on v6e/v7x) for large batches; small batches
    # padded to a bf16-packing-friendly multiple of 16.
    tm = 512 if m >= 512 else _round_up(max(m, 8), 16)
    m_pad = _round_up(m, tm)
    grid = (m_pad // tm,)

    # Lane-dense, zero-padded bf16 input slab (pad rows/cols once in the wrapper).
    x_p = jnp.zeros((m_pad, k_pad), jnp.bfloat16).at[:m, :k].set(
        x.astype(jnp.bfloat16))

    in_specs = [pl.BlockSpec((tm, k_pad), lambda i: (i, 0))]
    for arr in flat:
        # Constant index_map -> weight/bias DMA'd once, resident across the batch grid.
        in_specs.append(pl.BlockSpec(arr.shape, lambda i: (0, 0)))
    out_spec = pl.BlockSpec((tm, n_pad), lambda i: (i, 0))

    # Scoped-VMEM budget: resident weights + double-buffered x (bf16) / out (f32) tiles
    # + headroom; capped to stay comfortably inside v7x's 64 MiB physical VMEM.
    weight_bytes = sum(int(a.size) * a.dtype.itemsize for a in flat)
    act_bytes = 2 * tm * k_pad * 2 + 2 * tm * n_pad * 4
    vmem_limit = max(16 << 20,
                     min(int(1.5 * (weight_bytes + act_bytes)) + (4 << 20), 48 << 20))

    out = pl.pallas_call(
        functools.partial(_mlp_fused_kernel, n_layers=n_layers),
        out_shape=jax.ShapeDtypeStruct((m_pad, n_pad), jnp.float32),
        grid=grid,
        in_specs=in_specs,
        out_specs=out_spec,
        compiler_params=pltpu.CompilerParams(
            dimension_semantics=("parallel",),
            vmem_limit_bytes=vmem_limit,
        ),
    )(x_p, *flat)

    # TODO(synk): for configs whose summed padded weights approach VMEM, keep weights in
    # memory_space=pl.ANY and double-buffer per-layer with make_async_copy instead of the
    # resident-in-VMEM scheme above.
    # NOTE: this slice is one extra XLA pass over the output; downstream code that can
    # consume the padded (m_pad, n_pad) slab should take `out` directly.
    return out[:m, :output_dim]


# -------------------------------------------------------------- synthetic params / ref
def init_mlp_params(key, input_dim, output_dim, hidden_layer_width,
                    n_hidden_layers=1, init_zeros=True):
    """Deterministic synthetic parameters matching the PyTorch module's shapes
    (weights stored PyTorch-style as (out_features, in_features))."""
    params = []
    in_dim = input_dim
    for _ in range(n_hidden_layers):
        key, kw, kb = jax.random.split(key, 3)
        bound = 1.0 / jnp.sqrt(in_dim)
        w = jax.random.uniform(kw, (hidden_layer_width, in_dim),
                               jnp.float32, -bound, bound)
        b = jax.random.uniform(kb, (hidden_layer_width,),
                               jnp.float32, -bound, bound)
        params.append((w, b))
        in_dim = hidden_layer_width
    if init_zeros:
        w_out = jnp.zeros((output_dim, in_dim), jnp.float32)
        b_out = jnp.zeros((output_dim,), jnp.float32)
    else:
        key, kw, kb = jax.random.split(key, 3)
        bound = 1.0 / jnp.sqrt(in_dim)
        w_out = jax.random.uniform(kw, (output_dim, in_dim),
                                   jnp.float32, -bound, bound)
        b_out = jax.random.uniform(kb, (output_dim,), jnp.float32, -bound, bound)
    params.append((w_out, b_out))
    return params


def mlp_forward_ref(x, params):
    for (w, b) in params[:-1]:
        y = x @ w.T + b
        x = jnp.where(y >= 0, y, 0.01 * y)
    w_out, b_out = params[-1]
    return x @ w_out.T + b_out


# ---------------------------------------------------------------------------- main
if __name__ == "__main__":
    key = jax.random.PRNGKey(0)
    batch, input_dim, hidden, output_dim, n_hidden = 8, 16, 32, 16, 2

    k_x, k_p = jax.random.split(key)
    x = jax.random.normal(k_x, (batch, input_dim), jnp.float32)

    # init_zeros=False exercises the full (non-trivial) path.
    params = init_mlp_params(k_p, input_dim, output_dim, hidden,
                             n_hidden_layers=n_hidden, init_zeros=False)
    prepped = prepare_mlp_params(params)

    out = jax.block_until_ready(mlp_forward_pallas(x, prepped, output_dim))
    ref = mlp_forward_ref(x, params)
    assert out.shape == (batch, output_dim)
    # bf16 weights/activations (f32 accumulation): loosened tolerance vs. f32 reference.
    assert jnp.allclose(out, ref, atol=5e-2, rtol=5e-2)

    # init_zeros=True (the module's default): zero output layer -> zero output (exact).
    params_z = init_mlp_params(k_p, input_dim, output_dim, hidden,
                               n_hidden_layers=n_hidden, init_zeros=True)
    prepped_z = prepare_mlp_params(params_z)
    out_z = jax.block_until_ready(mlp_forward_pallas(x, prepped_z, output_dim))
    assert jnp.allclose(out_z, jnp.zeros_like(out_z))

    print("KERNEL_OK")
</pallas_src>

<mosaic_0001>
module attributes {stable_mosaic.version = 11 : i64} {
  func.func @_mlp_fused_kernel(%arg0: i32, %arg1: memref<16x128xbf16, #tpu.memory_space<vmem>>, %arg2: memref<128x128xbf16, #tpu.memory_space<vmem>>, %arg3: memref<1x128xf32, #tpu.memory_space<vmem>>, %arg4: memref<128x128xbf16, #tpu.memory_space<vmem>>, %arg5: memref<1x128xf32, #tpu.memory_space<vmem>>, %arg6: memref<128x128xbf16, #tpu.memory_space<vmem>>, %arg7: memref<1x128xf32, #tpu.memory_space<vmem>>, %arg8: memref<16x128xf32, #tpu.memory_space<vmem>>) attributes {dimension_semantics = [#tpu.dimension_semantics<parallel>], iteration_bounds = array<i64: 1>, scalar_prefetch = 0 : i64, scratch_operands = 0 : i64, tpu.core_type = #tpu.core_type<tc>, window_params = [{transform_indices = @transform_0, window_bounds = array<i64: 16, 128>}, {pipeline_mode = #tpu.pipeline_mode<synchronous>, transform_indices = @transform_1, window_bounds = array<i64: 128, 128>}, {pipeline_mode = #tpu.pipeline_mode<synchronous>, transform_indices = @transform_2, window_bounds = array<i64: 1, 128>}, {pipeline_mode = #tpu.pipeline_mode<synchronous>, transform_indices = @transform_3, window_bounds = array<i64: 128, 128>}, {pipeline_mode = #tpu.pipeline_mode<synchronous>, transform_indices = @transform_4, window_bounds = array<i64: 1, 128>}, {pipeline_mode = #tpu.pipeline_mode<synchronous>, transform_indices = @transform_5, window_bounds = array<i64: 128, 128>}, {pipeline_mode = #tpu.pipeline_mode<synchronous>, transform_indices = @transform_6, window_bounds = array<i64: 1, 128>}, {transform_indices = @transform_7, window_bounds = array<i64: 16, 128>}]} {
    %c0 = arith.constant 0 : index
    %c0_0 = arith.constant 0 : index
    %0 = vector.load %arg1[%c0, %c0_0] : memref<16x128xbf16, #tpu.memory_space<vmem>>, vector<16x128xbf16>
    %c0_1 = arith.constant 0 : index
    %c0_2 = arith.constant 0 : index
    %1 = vector.load %arg2[%c0_1, %c0_2] : memref<128x128xbf16, #tpu.memory_space<vmem>>, vector<128x128xbf16>
    %c0_3 = arith.constant 0 : index
    %c0_4 = arith.constant 0 : index
    %2 = vector.load %arg3[%c0_3, %c0_4] : memref<1x128xf32, #tpu.memory_space<vmem>>, vector<1x128xf32>
    %cst = arith.constant dense<0.000000e+00> : vector<16x128xf32>
    %3 = tpu.matmul %0, %1, %cst {dimension_numbers = #tpu.dot_dimension_numbers<[1], [0], [0], [1], [0, 0, 1, 1], [], []>} : vector<16x128xbf16>, vector<128x128xbf16>, vector<16x128xf32> -> vector<16x128xf32>
    %4 = vector.broadcast %2 : vector<1x128xf32> to vector<16x128xf32>
    %5 = arith.addf %3, %4 : vector<16x128xf32>
    %cst_5 = arith.constant 0.000000e+00 : f32
    %6 = vector.broadcast %cst_5 : f32 to vector<16x128xf32>
    %7 = arith.cmpf oge, %5, %6 : vector<16x128xf32>
    %cst_6 = arith.constant 0.00999999977 : f32
    %8 = vector.broadcast %cst_6 : f32 to vector<16x128xf32>
    %9 = arith.mulf %8, %5 : vector<16x128xf32>
    %10 = arith.select %7, %5, %9 : vector<16x128xi1>, vector<16x128xf32>
    %11 = arith.truncf %10 : vector<16x128xf32> to vector<16x128xbf16>
    %c0_7 = arith.constant 0 : index
    %c0_8 = arith.constant 0 : index
    %12 = vector.load %arg4[%c0_7, %c0_8] : memref<128x128xbf16, #tpu.memory_space<vmem>>, vector<128x128xbf16>
    %c0_9 = arith.constant 0 : index
    %c0_10 = arith.constant 0 : index
    %13 = vector.load %arg5[%c0_9, %c0_10] : memref<1x128xf32, #tpu.memory_space<vmem>>, vector<1x128xf32>
    %cst_11 = arith.constant dense<0.000000e+00> : vector<16x128xf32>
    %14 = tpu.matmul %11, %12, %cst_11 {dimension_numbers = #tpu.dot_dimension_numbers<[1], [0], [0], [1], [0, 0, 1, 1], [], []>} : vector<16x128xbf16>, vector<128x128xbf16>, vector<16x128xf32> -> vector<16x128xf32>
    %15 = vector.broadcast %13 : vector<1x128xf32> to vector<16x128xf32>
    %16 = arith.addf %14, %15 : vector<16x128xf32>
    %cst_12 = arith.constant 0.000000e+00 : f32
    %17 = vector.broadcast %cst_12 : f32 to vector<16x128xf32>
    %18 = arith.cmpf oge, %16, %17 : vector<16x128xf32>
    %cst_13 = arith.constant 0.00999999977 : f32
    %19 = vector.broadcast %cst_13 : f32 to vector<16x128xf32>
    %20 = arith.mulf %19, %16 : vector<16x128xf32>
    %21 = arith.select %18, %16, %20 : vector<16x128xi1>, vector<16x128xf32>
    %22 = arith.truncf %21 : vector<16x128xf32> to vector<16x128xbf16>
    %c0_14 = arith.constant 0 : index
    %c0_15 = arith.constant 0 : index
    %23 = vector.load %arg6[%c0_14, %c0_15] : memref<128x128xbf16, #tpu.memory_space<vmem>>, vector<128x128xbf16>
    %c0_16 = arith.constant 0 : index
    %c0_17 = arith.constant 0 : index
    %24 = vector.load %arg7[%c0_16, %c0_17] : memref<1x128xf32, #tpu.memory_space<vmem>>, vector<1x128xf32>
    %cst_18 = arith.constant dense<0.000000e+00> : vector<16x128xf32>
    %25 = tpu.matmul %22, %23, %cst_18 {dimension_numbers = #tpu.dot_dimension_numbers<[1], [0], [0], [1], [0, 0, 1, 1], [], []>} : vector<16x128xbf16>, vector<128x128xbf16>, vector<16x128xf32> -> vector<16x128xf32>
    %26 = vector.broadcast %24 : vector<1x128xf32> to vector<16x128xf32>
    %27 = arith.addf %25, %26 : vector<16x128xf32>
    %c0_19 = arith.constant 0 : index
    %c0_20 = arith.constant 0 : index
    %28 = vector.load %arg8[%c0_19, %c0_20] : memref<16x128xf32, #tpu.memory_space<vmem>>, vector<16x128xf32>
    tpu.vector_store %arg8[%c0_19, %c0_20], %27 {strides = array<i32>} : memref<16x128xf32, #tpu.memory_space<vmem>>, vector<16x128xf32>,
    return
  }
  func.func @transform_0(%arg0: i32) -> (i32, i32) {
    %c0_i32 = arith.constant 0 : i32
    %c0_i32_0 = arith.constant 0 : i32
    return %arg0, %c0_i32 : i32, i32
  }
  func.func @transform_1(%arg0: i32) -> (i32, i32) {
    %c0_i32 = arith.constant 0 : i32
    %c0_i32_0 = arith.constant 0 : i32
    %c0_i32_1 = arith.constant 0 : i32
    return %c0_i32, %c0_i32_0 : i32, i32
  }
  func.func @transform_2(%arg0: i32) -> (i32, i32) {
    %c0_i32 = arith.constant 0 : i32
    %c0_i32_0 = arith.constant 0 : i32
    %c0_i32_1 = arith.constant 0 : i32
    return %c0_i32, %c0_i32_0 : i32, i32
  }
  func.func @transform_3(%arg0: i32) -> (i32, i32) {
    %c0_i32 = arith.constant 0 : i32
    %c0_i32_0 = arith.constant 0 : i32
    %c0_i32_1 = arith.constant 0 : i32
    return %c0_i32, %c0_i32_0 : i32, i32
  }
  func.func @transform_4(%arg0: i32) -> (i32, i32) {
    %c0_i32 = arith.constant 0 : i32
    %c0_i32_0 = arith.constant 0 : i32
    %c0_i32_1 = arith.constant 0 : i32
    return %c0_i32, %c0_i32_0 : i32, i32
  }
  func.func @transform_5(%arg0: i32) -> (i32, i32) {
    %c0_i32 = arith.constant 0 : i32
    %c0_i32_0 = arith.constant 0 : i32
    %c0_i32_1 = arith.constant 0 : i32
    return %c0_i32, %c0_i32_0 : i32, i32
  }
  func.func @transform_6(%arg0: i32) -> (i32, i32) {
    %c0_i32 = arith.constant 0 : i32
    %c0_i32_0 = arith.constant 0 : i32
    %c0_i32_1 = arith.constant 0 : i32
    return %c0_i32, %c0_i32_0 : i32, i32
  }
  func.func @transform_7(%arg0: i32) -> (i32, i32) {
    %c0_i32 = arith.constant 0 : i32
    %c0_i32_0 = arith.constant 0 : i32
    return %arg0, %c0_i32 : i32, i32
  }
}

</mosaic_0001>

<bundles_post_ra>
// kernel: mlp_forward_pallas.1
= control target key start
LH: loop header
LB: loop body
LE: loop exit
PB: predicated region body
PF: predicated region fallthrough
CT: control target
= control target key end

     0   :  { %12 = vsyncpa [#allocation3], 0  ;;  %s798_s0 = inlined_call_operand.vmem [shape: bf16[16,128], index: 0, kind: input, shape index: {}]   ;;  %s799_s1 = inlined_call_operand.hbm [shape: bf16[128,128], index: 1, kind: input, shape index: {}]   ;;  %s800_s2 = inlined_call_operand.vmem [shape: f32[1,128], index: 2, kind: input, shape index: {}]   ;;  %s801_s3 = inlined_call_operand.hbm [shape: bf16[128,128], index: 3, kind: input, shape index: {}]   ;;  %s802_s4 = inlined_call_operand.vmem [shape: f32[1,128], index: 4, kind: input, shape index: {}]   ;;  %s803_s5 = inlined_call_operand.hbm [shape: bf16[128,128], index: 5, kind: input, shape index: {}]   ;;  %s804_s6 = inlined_call_operand.vmem [shape: f32[1,128], index: 6, kind: input, shape index: {}]   ;;  %s805_s7 = inlined_call_operand.vmem [shape: f32[16,128], index: 7, kind: output, shape index: {}]  }
   0x1   :  { %13 = vsyncpa [#allocation5], 0  ;;  %s651_s24 = smov [#allocation4]   ;;  %s652_s26 = smov [#allocation2]  }
   0x2   :  { %s35_s25 = sshll.u32 %s651_s24, 4  ;;  %s21_s27 = sshll.u32 %s652_s26, 4  ;;  %s36_s25 = int_to_ptr.vmem [resolvable:$true] %s35_s25  ;;  %s698_s27 = int_to_ptr.vmem [resolvable:$true] %s21_s27 }
   0x3   :  { %s581_s30 = scalar_lea.hbm %s801_s3, 1024 }
   0x4   :  { %p582_p0 = scmp.ne.s32.totalorder %s801_s3, %s581_s30  ;;  %p585_p1 = scmp.lt.u32.totalorder %s581_s30, %s801_s3 }
   0x6   :  { %p587_p2 = pnand %p585_p1, %p582_p0 }
   0x8   :  { %590 = shalt.err (!%p587_p2)
}
   0x9   :  { %s591_s12 = scalar_lea.vmem %s36_s25, 1024  ;;  %p596_p4 = scmp.lt.s32.totalorder %s36_s25, %s36_s25 }
   0xa   :  { %p592_p3 = scmp.ne.s32.totalorder %s36_s25, %s591_s12  ;;  %p597_p5 = scmp.lt.s32.totalorder %s591_s12, %s591_s12 }
   0xc   :  { %p598_p6 = por %p597_p5, %p596_p4 }
   0xe   :  { %p599_p7 = pnand %p598_p6, %p592_p3 }
  0x10   :  { %602 = shalt.err (!%p599_p7)
}
  0x11   :  { %s653_s13 = smov 64   ;;  %s654_s14 = smov 4  }
  0x12   :  { %41 = dma.hbm_to_vmem [thread:$0]  %s801_s3, 1024, %s36_s25, [#allocation5], %s653_s13, %s653_s13, %s654_s14  }
  0x13   :  { %s603_s19 = scalar_lea.hbm %s799_s1, 1024 }
  0x14   :  { %p604_p8 = scmp.ne.s32.totalorder %s799_s1, %s603_s19  ;;  %p607_p9 = scmp.lt.u32.totalorder %s603_s19, %s799_s1 }
  0x16   :  { %p609_p10 = pnand %p607_p9, %p604_p8 }
  0x18   :  { %612 = shalt.err (!%p609_p10)
}
  0x19   :  { %s613_s24 = scalar_lea.vmem %s698_s27, 1024  ;;  %p618_p12 = scmp.lt.s32.totalorder %s698_s27, %s698_s27 }
  0x1a   :  { %p614_p11 = scmp.ne.s32.totalorder %s698_s27, %s613_s24  ;;  %p619_p13 = scmp.lt.s32.totalorder %s613_s24, %s613_s24 }
  0x1c   :  { %p620_p0 = por %p619_p13, %p618_p12 }
  0x1e   :  { %p621_p1 = pnand %p620_p0, %p614_p11 }
  0x20   :  { %624 = shalt.err (!%p621_p1)
}
  0x21   :  { %27 = dma.hbm_to_vmem [thread:$0]  %s799_s1, 1024, %s698_s27, [#allocation3], %s653_s13, %s653_s13, %s654_s14  }
  0x22   :  { %s655_s26 = smov [#allocation6]   ;;  %s625_s8 = scalar_lea.hbm %s803_s5, 1024 }
  0x23   :  { %s49_s28 = sshll.u32 %s655_s26, 4  ;;  %p626_p2 = scmp.ne.s32.totalorder %s803_s5, %s625_s8  ;;  %s50_s28 = int_to_ptr.vmem [resolvable:$true] %s49_s28 }
  0x24   :  { %p629_p3 = scmp.lt.u32.totalorder %s625_s8, %s803_s5 }
  0x26   :  { %p631_p4 = pnand %p629_p3, %p626_p2 }
  0x28   :  { %634 = shalt.err (!%p631_p4)
}
  0x29   :  { %s635_s15 = scalar_lea.vmem %s50_s28, 1024  ;;  %p640_p6 = scmp.lt.s32.totalorder %s50_s28, %s50_s28 }
  0x2a   :  { %p636_p5 = scmp.ne.s32.totalorder %s50_s28, %s635_s15  ;;  %p641_p7 = scmp.lt.s32.totalorder %s635_s15, %s635_s15 }
  0x2c   :  { %p642_p8 = por %p641_p7, %p640_p6 }
  0x2e   :  { %p643_p9 = pnand %p642_p8, %p636_p5 }
  0x30   :  { %646 = shalt.err (!%p643_p9)
}
  0x31   :  { %55 = dma.hbm_to_vmem [thread:$0]  %s803_s5, 1024, %s50_s28, [#allocation5], %s653_s13, %s653_s13, %s654_s14  }
  0x32   :  { %647 = dma.done.wait [#allocation3], 1024  }
  0x33   :  { %648 = vsyncadd [#allocation3], 4294966272 }
  0x34   :  { %649 = dma.done.wait [#allocation5], 2048  }
  0x35   :  { %650 = vsyncadd [#allocation5], 4294965248  ;;  %v656_v0 = vmov 0.0   ;;  %vm657_vm0 = vmmov 0   ;;  %v556_v1 = vld [vmem:[#allocation2] sm:$0xff]   ;;  %v557_v2 = vld [vmem:[#allocation2 + $0x8] sm:$0xff]  }
  0x36   :  { %489 = vmatprep.subr.bf16.mxu0 %v656_v0  ;;  %505 = vmatprep.mubr.msk.bf16.mxu0 %vm657_vm0, %v656_v0  ;;  %v558_v3 = vld [vmem:[#allocation2 + $0x10] sm:$0xff]   ;;  %v565_v4 = vld [vmem:[#allocation4] sm:$0xff]   ;;  %v559_v5 = vld [vmem:[#allocation2 + $0x18] sm:$0xff]  }
  0x37   :  { %509 = vmatprep.subr.bf16.mxu1 %v656_v0  ;;  %525 = vmatprep.mubr.msk.bf16.mxu1 %vm657_vm0, %v656_v0  ;;  %v566_v6 = vld [vmem:[#allocation4 + $0x8] sm:$0xff]   ;;  %v560_v7 = vld [vmem:[#allocation2 + $0x20] sm:$0xff]   ;;  %v567_v8 = vld [vmem:[#allocation4 + $0x10] sm:$0xff]  }
  0x38   :  { %490 = vmatpush3.bf16.msra.mxu0 %v556_v1  ;;  %510 = vmatpush3.bf16.msra.mxu1 %v565_v4  ;;  %v561_v9 = vld [vmem:[#allocation2 + $0x28] sm:$0xff]   ;;  %v568_v10 = vld [vmem:[#allocation4 + $0x18] sm:$0xff]   ;;  %v562_v11 = vld [vmem:[#allocation2 + $0x30] sm:$0xff]  }
  0x39   :  { %491 = vmatprep.subr.bf16.mxu0 %v656_v0  ;;  %511 = vmatprep.subr.bf16.mxu1 %v656_v0  ;;  %v569_v12 = vld [vmem:[#allocation4 + $0x20] sm:$0xff]   ;;  %v563_v13 = vld [vmem:[#allocation2 + $0x38] sm:$0xff]   ;;  %v570_v14 = vld [vmem:[#allocation4 + $0x28] sm:$0xff]  }
  0x3a   :  { %v564_v15 = vld [vmem:[%s798_s0] sm:$0xff]   ;;  %v571_v16 = vld [vmem:[#allocation4 + $0x30] sm:$0xff]   ;;  %v572_v17 = vld [vmem:[#allocation4 + $0x38] sm:$0xff]  }
  0x3b   :  { %v573_v18 = vld [vmem:[#allocation6] sm:$0xff]   ;;  %v574_v19 = vld [vmem:[#allocation6 + $0x8] sm:$0xff]   ;;  %v575_v20 = vld [vmem:[#allocation6 + $0x10] sm:$0xff]  }
  0x3c   :  { %492 = vmatpush3.bf16.msra.mxu0 %v557_v2  ;;  %512 = vmatpush3.bf16.msra.mxu1 %v566_v6  ;;  %v576_v21 = vld [vmem:[#allocation6 + $0x18] sm:$0xff]   ;;  %v577_v22 = vld [vmem:[#allocation6 + $0x20] sm:$0xff]   ;;  %v578_v23 = vld [vmem:[#allocation6 + $0x28] sm:$0xff]  }
  0x3d   :  { %493 = vmatprep.subr.bf16.mxu0 %v656_v0  ;;  %513 = vmatprep.subr.bf16.mxu1 %v656_v0  ;;  %v434_v24 = vld [vmem:[%s800_s2] ss:$0 sm:$0xff]  ;;  %v579_v36 = vld [vmem:[#allocation6 + $0x30] sm:$0xff]   ;;  %v580_v37 = vld [vmem:[#allocation6 + $0x38] sm:$0xff]  }
  0x3e   :  { %v444_v38 = vld [vmem:[%s802_s4] ss:$0 sm:$0xff] }
  0x3f   :  { %v453_v50 = vld [vmem:[%s804_s6] ss:$0 sm:$0xff] }
  0x40   :  { %494 = vmatpush3.bf16.msra.mxu0 %v558_v3  ;;  %514 = vmatpush3.bf16.msra.mxu1 %v567_v8 }
  0x41   :  { %495 = vmatprep.subr.bf16.mxu0 %v656_v0  ;;  %515 = vmatprep.subr.bf16.mxu1 %v656_v0 }
  0x44   :  { %496 = vmatpush3.bf16.msra.mxu0 %v559_v5  ;;  %516 = vmatpush3.bf16.msra.mxu1 %v568_v10 }
  0x45   :  { %497 = vmatprep.subr.bf16.mxu0 %v656_v0  ;;  %517 = vmatprep.subr.bf16.mxu1 %v656_v0 }
  0x48   :  { %498 = vmatpush3.bf16.msra.mxu0 %v560_v7  ;;  %518 = vmatpush3.bf16.msra.mxu1 %v569_v12 }
  0x49   :  { %499 = vmatprep.subr.bf16.mxu0 %v656_v0  ;;  %519 = vmatprep.subr.bf16.mxu1 %v656_v0 }
  0x4c   :  { %500 = vmatpush3.bf16.msra.mxu0 %v561_v9  ;;  %520 = vmatpush3.bf16.msra.mxu1 %v570_v14 }
  0x4d   :  { %501 = vmatprep.subr.bf16.mxu0 %v656_v0  ;;  %521 = vmatprep.subr.bf16.mxu1 %v656_v0 }
  0x50   :  { %502 = vmatpush3.bf16.msra.mxu0 %v562_v11  ;;  %522 = vmatpush3.bf16.msra.mxu1 %v571_v16 }
  0x51   :  { %503 = vmatprep.subr.bf16.mxu0 %v656_v0  ;;  %523 = vmatprep.subr.bf16.mxu1 %v656_v0 }
  0x54   :  { %504 = vmatpush3.bf16.msra.mxu0 %v563_v13  ;;  %524 = vmatpush3.bf16.msra.mxu1 %v572_v17 }
  0x55   :  { %529 = vmatprep.subr.bf16.mxu0 %v656_v0 }
  0x57   :  { %506 = vmatmul.mubr.bf16.vlgmr.msra.gmra.mrb[0].mxu0 %v564_v15 }
  0x58   :  { %545 = vmatprep.mubr.msk.bf16.mxu0 %vm657_vm0, %v656_v0  ;;  %530 = vmatpush3.bf16.msra.mxu0 %v573_v18 }
  0x59   :  { %531 = vmatprep.subr.bf16.mxu0 %v656_v0 }
  0x5c   :  { %532 = vmatpush3.bf16.msra.mxu0 %v574_v19 }
  0x5d   :  { %533 = vmatprep.subr.bf16.mxu0 %v656_v0 }
  0x60   :  { %534 = vmatpush3.bf16.msra.mxu0 %v575_v20 }
  0x61   :  { %535 = vmatprep.subr.bf16.mxu0 %v656_v0 }
  0x64   :  { %536 = vmatpush3.bf16.msra.mxu0 %v576_v21 }
  0x65   :  { %537 = vmatprep.subr.bf16.mxu0 %v656_v0 }
  0x68   :  { %538 = vmatpush3.bf16.msra.mxu0 %v577_v22 }
  0x69   :  { %539 = vmatprep.subr.bf16.mxu0 %v656_v0 }
  0x6c   :  { %540 = vmatpush3.bf16.msra.mxu0 %v578_v23 }
  0x6d   :  { %541 = vmatprep.subr.bf16.mxu0 %v656_v0 }
  0x70   :  { %542 = vmatpush3.bf16.msra.mxu0 %v579_v36 }
  0x71   :  { %543 = vmatprep.subr.bf16.mxu0 %v656_v0 }
  0x74   :  { %544 = vmatpush3.bf16.msra.mxu0 %v580_v37 }
 0x12a   :  { %v181_v25 = vpop.f32.mrb[0].mxu0 }
 0x12b   :  { %v182_v26 = vadd.f32 %v434_v24, %v181_v25  ;;  %v507_v27 = vpop.f32.mrb[1].mxu0 }
 0x12c   :  { %v184_v28 = vpop.f32.mrb[2].mxu0 }
 0x12d   :  { %v190_v29 = vmul.f32 0.01, %v182_v26  ;;  %v185_v30 = vadd.f32 %v434_v24, %v184_v28  ;;  %v508_v31 = vpop.f32.mrb[3].mxu0  ;;  %vm188_vm1 = vcmp.ge.f32.partialorder %v182_v26, 0.0 }
 0x12f   :  { %vm189_vm2 = vcmp.ge.f32.partialorder %v185_v30, 0.0  ;;  %v191_v32 = vmul.f32 0.01, %v185_v30  ;;  %v192_v33 = vsel %vm188_vm1, %v182_v26, %v190_v29 }
 0x131   :  { %v193_v34 = vsel %vm189_vm2, %v185_v30, %v191_v32 }
 0x132   :  { %v194_v35 = vpack.c.bf16 %v193_v34, %v192_v33 }
 0x134   :  { %526 = vmatmul.mubr.bf16.vlgmr.msra.gmra.mrb[0].mxu1 %v194_v35 }
 0x207   :  { %v300_v39 = vpop.f32.mrb[0].mxu1 }
 0x208   :  { %v301_v40 = vadd.f32 %v444_v38, %v300_v39  ;;  %v527_v41 = vpop.f32.mrb[1].mxu1 }
 0x209   :  { %v303_v42 = vpop.f32.mrb[2].mxu1 }
 0x20a   :  { %v309_v43 = vmul.f32 0.01, %v301_v40  ;;  %v304_v44 = vadd.f32 %v444_v38, %v303_v42  ;;  %v528_v45 = vpop.f32.mrb[3].mxu1  ;;  %vm307_vm3 = vcmp.ge.f32.partialorder %v301_v40, 0.0 }
 0x20c   :  { %vm308_vm4 = vcmp.ge.f32.partialorder %v304_v44, 0.0  ;;  %v310_v46 = vmul.f32 0.01, %v304_v44  ;;  %v311_v47 = vsel %vm307_vm3, %v301_v40, %v309_v43 }
 0x20e   :  { %v312_v48 = vsel %vm308_vm4, %v304_v44, %v310_v46 }
 0x20f   :  { %v313_v49 = vpack.c.bf16 %v312_v48, %v311_v47 }
 0x211   :  { %546 = vmatmul.mubr.bf16.vlgmr.msra.gmra.mrb[4].mxu0 %v313_v49 }
 0x2e4   :  { %v419_v51 = vpop.f32.mrb[4].mxu0 }
 0x2e5   :  { %v420_v52 = vadd.f32 %v453_v50, %v419_v51  ;;  %v547_v53 = vpop.f32.mrb[5].mxu0 }
 0x2e6   :  { %v422_v54 = vpop.f32.mrb[6].mxu0 }
 0x2e7   :  { %426 = vst [vmem:[%s805_s7] sm:$0xff] %v420_v52  ;;  %v423_v55 = vadd.f32 %v453_v50, %v422_v54  ;;  %v548_v56 = vpop.f32.mrb[7].mxu0 }
 0x2e9   :  { %427 = vst [vmem:[%s805_s7 + $0x8] sm:$0xff] %v423_v55 }
 0x2ea   :  { %432 = vsyncpa [#allocation3], 1 }
 0x2eb   :  { %433 = vsyncpa [#allocation5], 1 }

</bundles_post_ra>
